<compile_context>
chip_gen: v7x
topology: tpu7x:2x2x1
jax: 0.10.0
libtpu: 0.0.40
codegen_flags: <defaults>
</compile_context>

<pallas_src>
import functools

import jax
import jax.numpy as jnp
from jax.experimental import pallas as pl
from jax.experimental.pallas import tpu as pltpu


def _sdpa_kernel(q_ref, k_ref, v_ref, ctx_ref, attn_ref, *, inv_sqrt_dk):
    # Block shapes: q (1, Hc, TQ, Dk), k/v (1, Hc, S, Dk),
    #               ctx (1, Hc, TQ, Dk), attn (1, Hc, TQ, S).
    q = q_ref[0]                                     # (Hc, TQ, Dk), native dtype
    k = k_ref[0]                                     # (Hc, S,  Dk)
    v = v_ref[0]                                     # (Hc, S,  Dk)

    # Fold 1/sqrt(d_k) into Q: S*Dk multiplies instead of S*S divides.
    q = q * jnp.asarray(inv_sqrt_dk, dtype=q.dtype)

    # scores = Q @ K^T, batched over heads, contracting Dk directly
    # (no explicit K transpose); f32 accumulation on the MXU.
    scores = jax.lax.dot_general(
        q, k,
        dimension_numbers=(((2,), (2,)), ((0,), (0,))),
        preferred_element_type=jnp.float32,
    )                                                # (Hc, TQ, S) f32

    # numerically stable softmax over the key axis
    m = jnp.max(scores, axis=-1, keepdims=True)
    e = jnp.exp(scores - m)
    denom = jnp.sum(e, axis=-1, keepdims=True)
    p = e * pl.reciprocal(denom, approx=True)        # (Hc, TQ, S) f32

    # dropout: identity in eval mode
    attn_ref[0] = p.astype(attn_ref.dtype)

    # context = attn_prob @ V  (probs cast to V's dtype for the MXU)
    ctx = jax.lax.dot_general(
        p.astype(v.dtype), v,
        dimension_numbers=(((2,), (1,)), ((0,), (0,))),
        preferred_element_type=jnp.float32,
    )                                                # (Hc, TQ, Dk) f32
    ctx_ref[0] = ctx.astype(ctx_ref.dtype)


def _q_tile_candidates(S, cap=512):
    """Valid TQ values: divisors of S that are multiples of 8, plus S itself."""
    cands = {S}
    for t in range(8, min(S, cap) + 1, 8):
        if S % t == 0:
            cands.add(t)
    return sorted(cands, reverse=True)


def _vmem_estimate(hc, tq, S, Dk, in_bytes, attn_bytes):
    # double-buffered Q/K/V input tiles + double-buffered outputs
    # + f32 live intermediates (scores / exp / probs)
    ins = 2 * (hc * tq * Dk + 2 * hc * S * Dk) * in_bytes
    outs = 2 * (hc * tq * Dk * in_bytes + hc * tq * S * attn_bytes)
    live = 3 * hc * tq * S * 4
    return ins + outs + live


def scaled_dot_product_attention(Q, K, V, d_k=None, dropout_attn=0.0):
    """Pallas equivalent of ScaledDotProductAttention.forward(Q, K, V, mask=None).

    Q, K, V: [B, H, S, Dk].  Returns (context [B,H,S,Dk], attn_prob [B,H,S,S]).
    """
    B, H, S, Dk = Q.shape
    if d_k is None:
        d_k = Dk
    inv_sqrt_dk = 1.0 / (float(d_k) ** 0.5)

    in_bytes = jnp.dtype(Q.dtype).itemsize
    attn_dtype = Q.dtype
    attn_bytes = jnp.dtype(attn_dtype).itemsize

    # ---- tile selection: bound VMEM independent of S ----
    q_cands = _q_tile_candidates(S)
    tq = next((t for t in q_cands if t <= 256), q_cands[-1])

    hc = 1
    if Dk < 128:  # pack heads per step to amortize per-step overhead for small Dk
        max_hc = min(H, max(1, 128 // Dk))
        for c in range(max_hc, 0, -1):
            if H % c == 0:
                hc = c
                break

    budget = 24 * 1024 * 1024
    while _vmem_estimate(hc, tq, S, Dk, in_bytes, attn_bytes) > budget:
        smaller_tq = next((t for t in q_cands if t < tq), None)
        if smaller_tq is not None:
            tq = smaller_tq
            continue
        if hc > 1:
            hc = next(c for c in range(hc - 1, 0, -1) if H % c == 0)
            continue
        break

    grid = (B, H // hc, S // tq)

    kernel = functools.partial(_sdpa_kernel, inv_sqrt_dk=inv_sqrt_dk)

    q_spec = pl.BlockSpec((1, hc, tq, Dk), lambda b, h, qi: (b, h, qi, 0))
    kv_spec = pl.BlockSpec((1, hc, S, Dk), lambda b, h, qi: (b, h, 0, 0))
    ctx_spec = pl.BlockSpec((1, hc, tq, Dk), lambda b, h, qi: (b, h, qi, 0))
    attn_spec = pl.BlockSpec((1, hc, tq, S), lambda b, h, qi: (b, h, qi, 0))

    est = _vmem_estimate(hc, tq, S, Dk, in_bytes, attn_bytes)
    vmem_limit = None
    if est > 12 * 1024 * 1024:
        # explicit limit for large shapes; keep under v7x's 64 MiB physical VMEM
        vmem_limit = int(min(max(2 * est, 32 * 1024 * 1024), 56 * 1024 * 1024))

    cost = pl.CostEstimate(
        flops=4 * B * H * S * S * Dk,
        transcendentals=B * H * S * S,
        bytes_accessed=4 * B * H * S * Dk * in_bytes + B * H * S * S * attn_bytes,
    )

    ctx, attn = pl.pallas_call(
        kernel,
        out_shape=(
            jax.ShapeDtypeStruct((B, H, S, Dk), Q.dtype),
            jax.ShapeDtypeStruct((B, H, S, S), attn_dtype),
        ),
        grid_spec=pltpu.PrefetchScalarGridSpec(
            num_scalar_prefetch=0,
            grid=grid,
            in_specs=[q_spec, kv_spec, kv_spec],
            out_specs=(ctx_spec, attn_spec),
        ),
        compiler_params=pltpu.CompilerParams(
            dimension_semantics=("parallel", "parallel", "parallel"),
            vmem_limit_bytes=vmem_limit,
        ),
        cost_estimate=cost,
    )(Q, K, V)
    return ctx, attn


def _reference(Q, K, V, d_k):
    scores = jnp.einsum("bhqd,bhkd->bhqk", Q, K) / (d_k ** 0.5)
    p = jax.nn.softmax(scores, axis=-1)
    ctx = jnp.einsum("bhqk,bhkd->bhqd", p, V)
    return ctx, p


if __name__ == "__main__":
    B, H, S, Dk = 2, 2, 8, 32
    key = jax.random.PRNGKey(0)
    kq, kk, kv = jax.random.split(key, 3)
    Q = jax.random.normal(kq, (B, H, S, Dk), dtype=jnp.float32)
    K = jax.random.normal(kk, (B, H, S, Dk), dtype=jnp.float32)
    V = jax.random.normal(kv, (B, H, S, Dk), dtype=jnp.float32)

    ctx, attn = scaled_dot_product_attention(Q, K, V, d_k=Dk, dropout_attn=0.0)
    jax.block_until_ready((ctx, attn))

    ref_ctx, ref_attn = _reference(Q, K, V, Dk)
    # tolerance covers the EUP approximate-reciprocal softmax denominator
    assert jnp.allclose(ctx, ref_ctx, atol=2e-3, rtol=2e-3)
    assert jnp.allclose(attn, ref_attn, atol=2e-3, rtol=2e-3)

    print("KERNEL_OK")
</pallas_src>

<mosaic_0001>
module attributes {stable_mosaic.version = 11 : i64} {
  func.func @_sdpa_kernel(%arg0: i32, %arg1: i32, %arg2: i32, %arg3: memref<1x2x8x32xf32, #tpu.memory_space<vmem>>, %arg4: memref<1x2x8x32xf32, #tpu.memory_space<vmem>>, %arg5: memref<1x2x8x32xf32, #tpu.memory_space<vmem>>, %arg6: memref<1x2x8x32xf32, #tpu.memory_space<vmem>>, %arg7: memref<1x2x8x8xf32, #tpu.memory_space<vmem>>) attributes {dimension_semantics = [#tpu.dimension_semantics<parallel>, #tpu.dimension_semantics<parallel>, #tpu.dimension_semantics<parallel>], iteration_bounds = array<i64: 2, 1, 1>, scalar_prefetch = 0 : i64, scratch_operands = 0 : i64, tpu.core_type = #tpu.core_type<tc>, window_params = [{transform_indices = @transform_0, window_bounds = array<i64: 1, 2, 8, 32>}, {transform_indices = @transform_1, window_bounds = array<i64: 1, 2, 8, 32>}, {transform_indices = @transform_2, window_bounds = array<i64: 1, 2, 8, 32>}, {transform_indices = @transform_3, window_bounds = array<i64: 1, 2, 8, 32>}, {transform_indices = @transform_4, window_bounds = array<i64: 1, 2, 8, 8>}]} {
    %c0 = arith.constant 0 : index
    %c0_0 = arith.constant 0 : index
    %c0_1 = arith.constant 0 : index
    %c0_2 = arith.constant 0 : index
    %0 = vector.load %arg3[%c0, %c0_0, %c0_1, %c0_2] : memref<1x2x8x32xf32, #tpu.memory_space<vmem>>, vector<1x2x8x32xf32>
    %1 = vector.shape_cast %0 : vector<1x2x8x32xf32> to vector<2x8x32xf32>
    %c0_3 = arith.constant 0 : index
    %c0_4 = arith.constant 0 : index
    %c0_5 = arith.constant 0 : index
    %c0_6 = arith.constant 0 : index
    %2 = vector.load %arg4[%c0_3, %c0_4, %c0_5, %c0_6] : memref<1x2x8x32xf32, #tpu.memory_space<vmem>>, vector<1x2x8x32xf32>
    %3 = vector.shape_cast %2 : vector<1x2x8x32xf32> to vector<2x8x32xf32>
    %c0_7 = arith.constant 0 : index
    %c0_8 = arith.constant 0 : index
    %c0_9 = arith.constant 0 : index
    %c0_10 = arith.constant 0 : index
    %4 = vector.load %arg5[%c0_7, %c0_8, %c0_9, %c0_10] : memref<1x2x8x32xf32, #tpu.memory_space<vmem>>, vector<1x2x8x32xf32>
    %5 = vector.shape_cast %4 : vector<1x2x8x32xf32> to vector<2x8x32xf32>
    %cst = arith.constant 0.176776692 : f32
    %6 = vector.broadcast %cst : f32 to vector<2x8x32xf32>
    %7 = arith.mulf %1, %6 : vector<2x8x32xf32>
    %cst_11 = arith.constant dense<0.000000e+00> : vector<2x8x8xf32>
    %8 = tpu.matmul %7, %3, %cst_11 {dimension_numbers = #tpu.dot_dimension_numbers<[2], [2], [1], [1], [0, 0, 0, 1, 1, 1], [0], [0]>} : vector<2x8x32xf32>, vector<2x8x32xf32>, vector<2x8x8xf32> -> vector<2x8x8xf32>
    %cst_12 = arith.constant dense<0xFF800000> : vector<2x8xf32>
    %9 = vector.multi_reduction <maximumf>, %8, %cst_12 [2] : vector<2x8x8xf32> to vector<2x8xf32>
    %10 = vector.shape_cast %9 : vector<2x8xf32> to vector<2x8x1xf32>
    %11 = vector.broadcast %10 : vector<2x8x1xf32> to vector<2x8x8xf32>
    %12 = arith.subf %8, %11 : vector<2x8x8xf32>
    %13 = math.exp %12 : vector<2x8x8xf32>
    %cst_13 = arith.constant dense<0.000000e+00> : vector<2x8xf32>
    %14 = vector.multi_reduction <add>, %13, %cst_13 [2] : vector<2x8x8xf32> to vector<2x8xf32>
    %15 = vector.shape_cast %14 : vector<2x8xf32> to vector<2x8x1xf32>
    %16 = tpu.reciprocal %15 {approx = true} : vector<2x8x1xf32> -> vector<2x8x1xf32>
    %17 = vector.broadcast %16 : vector<2x8x1xf32> to vector<2x8x8xf32>
    %18 = arith.mulf %13, %17 : vector<2x8x8xf32>
    %c0_14 = arith.constant 0 : index
    %c0_15 = arith.constant 0 : index
    %c0_16 = arith.constant 0 : index
    %c0_17 = arith.constant 0 : index
    %19 = vector.load %arg7[%c0_14, %c0_15, %c0_16, %c0_17] : memref<1x2x8x8xf32, #tpu.memory_space<vmem>>, vector<1x2x8x8xf32>
    %20 = vector.shape_cast %19 : vector<1x2x8x8xf32> to vector<2x8x8xf32>
    %21 = vector.shape_cast %18 : vector<2x8x8xf32> to vector<1x2x8x8xf32>
    tpu.vector_store %arg7[%c0_14, %c0_15, %c0_16, %c0_17], %21 {strides = array<i32>} : memref<1x2x8x8xf32, #tpu.memory_space<vmem>>, vector<1x2x8x8xf32>,
    %cst_18 = arith.constant dense<0.000000e+00> : vector<2x8x32xf32>
    %22 = tpu.matmul %18, %5, %cst_18 {dimension_numbers = #tpu.dot_dimension_numbers<[2], [1], [1], [2], [0, 0, 0, 1, 1, 2], [0], [0]>} : vector<2x8x8xf32>, vector<2x8x32xf32>, vector<2x8x32xf32> -> vector<2x8x32xf32>
    %c0_19 = arith.constant 0 : index
    %c0_20 = arith.constant 0 : index
    %c0_21 = arith.constant 0 : index
    %c0_22 = arith.constant 0 : index
    %23 = vector.load %arg6[%c0_19, %c0_20, %c0_21, %c0_22] : memref<1x2x8x32xf32, #tpu.memory_space<vmem>>, vector<1x2x8x32xf32>
    %24 = vector.shape_cast %23 : vector<1x2x8x32xf32> to vector<2x8x32xf32>
    %25 = vector.shape_cast %22 : vector<2x8x32xf32> to vector<1x2x8x32xf32>
    tpu.vector_store %arg6[%c0_19, %c0_20, %c0_21, %c0_22], %25 {strides = array<i32>} : memref<1x2x8x32xf32, #tpu.memory_space<vmem>>, vector<1x2x8x32xf32>,
    return
  }
  func.func @transform_0(%arg0: i32, %arg1: i32, %arg2: i32) -> (i32, i32, i32, i32) {
    %c0_i32 = arith.constant 0 : i32
    %c0_i32_0 = arith.constant 0 : i32
    return %arg0, %arg1, %arg2, %c0_i32 : i32, i32, i32, i32
  }
  func.func @transform_1(%arg0: i32, %arg1: i32, %arg2: i32) -> (i32, i32, i32, i32) {
    %c0_i32 = arith.constant 0 : i32
    %c0_i32_0 = arith.constant 0 : i32
    %c0_i32_1 = arith.constant 0 : i32
    return %arg0, %arg1, %c0_i32, %c0_i32_0 : i32, i32, i32, i32
  }
  func.func @transform_2(%arg0: i32, %arg1: i32, %arg2: i32) -> (i32, i32, i32, i32) {
    %c0_i32 = arith.constant 0 : i32
    %c0_i32_0 = arith.constant 0 : i32
    %c0_i32_1 = arith.constant 0 : i32
    return %arg0, %arg1, %c0_i32, %c0_i32_0 : i32, i32, i32, i32
  }
  func.func @transform_3(%arg0: i32, %arg1: i32, %arg2: i32) -> (i32, i32, i32, i32) {
    %c0_i32 = arith.constant 0 : i32
    %c0_i32_0 = arith.constant 0 : i32
    return %arg0, %arg1, %arg2, %c0_i32 : i32, i32, i32, i32
  }
  func.func @transform_4(%arg0: i32, %arg1: i32, %arg2: i32) -> (i32, i32, i32, i32) {
    %c0_i32 = arith.constant 0 : i32
    %c0_i32_0 = arith.constant 0 : i32
    return %arg0, %arg1, %arg2, %c0_i32 : i32, i32, i32, i32
  }
}

</mosaic_0001>

<bundles_post_ra>
// kernel: tpu_custom_call.1
= control target key start
LH: loop header
LB: loop body
LE: loop exit
PB: predicated region body
PF: predicated region fallthrough
CT: control target
= control target key end

     0   :  { %s1650_s0 = inlined_call_operand.hbm [shape: f32[2,2,8,32], index: 0, kind: input, shape index: {}]   ;;  %s1651_s1 = inlined_call_operand.hbm [shape: f32[2,2,8,32], index: 1, kind: input, shape index: {}]   ;;  %s1652_s2 = inlined_call_operand.hbm [shape: f32[2,2,8,32], index: 2, kind: input, shape index: {}]   ;;  %s1653_s3 = inlined_call_operand.hbm [shape: f32[2,2,8,32], index: 3, kind: output, shape index: {0}]   ;;  %s1654_s4 = inlined_call_operand.hbm [shape: f32[2,2,8,8], index: 4, kind: output, shape index: {1}]  }
   0x1   :  { %1666 = sst [smem:[#allocation19_spill]] %s1651_s1 }
   0x2   :  { %10 = vsyncpa [#allocation3], 0 }
   0x3   :  { %12 = vsyncpa [#allocation3 + $0x1], 0 }
   0x4   :  { %13 = vsyncpa [#allocation6], 0 }
   0x5   :  { %15 = vsyncpa [#allocation6 + $0x1], 0 }
   0x6   :  { %16 = vsyncpa [#allocation4], 0 }
   0x7   :  { %18 = vsyncpa [#allocation4 + $0x1], 0 }
   0x8   :  { %19 = vsyncpa [#allocation10], 0 }
   0x9   :  { %21 = vsyncpa [#allocation10 + $0x1], 0  ;;  %s1306_s15 = smov 0   ;;  %s1308_s16 = smov 0  }
   0xa   :  { %s1310_s17 = smov 0   ;;  %s1312_s18 = smov 0  }
   0xb   :  { %s1314_s19 = smov 0   ;;  %s1316_s20 = smov 0  }
   0xc LB: > { %1667 = sst [smem:[#allocation15_spill]] %s1264_s19  ;;  %s1337_s21 = sadd.s32 4294967295, %s1268_s20   ;;  %s1268_s20 = sphi %s1316_s20, %s27_s20   ;;  %s1264_s19 = sphi %s1314_s19, %s1692_s19   ;;  %s1260_s18 = sphi %s1312_s18, %s1691_s18   ;;  %s1256_s17 = sphi %s1310_s17, %s1695_s17   ;;  %s1252_s16 = sphi %s1308_s16, %s1694_s16   ;;  %s1248_s15 = sphi %s1306_s15, %s1693_s15  }
   0xd   : > { %1668 = sst [smem:[#allocation16_spill]] %s1268_s20  ;;  %s904_s22 = sadd.s32 4294967294, %s1268_s20  }
   0xe   : > { %s46_s23 = sadd.s32 1, %s1264_s19  ;;  %s57_s24 = sadd.s32 1, %s1256_s17 }
   0xf   : > { %p48_p0 = scmp.ge.s32.totalorder %s46_s23, 2  ;;  %p64_p1 = scmp.ne.s32.totalorder %s1256_s17, %s1252_s16 }
  0x10   : > { %p65_p2 = scmp.eq.s32.totalorder %s1268_s20, 0  ;;  %p70_p3 = scmp.ne.s32.totalorder %s1252_s16, %s1248_s15 }
  0x11   : > { %s1697_s23 = smov (%p48_p0, %s46_s23), 0  ;;  %p71_p5 = scmp.eq.s32.totalorder %s1337_s21, 0 }
  0x12   : > { %1669 = sst [smem:[#allocation17_spill]] %s1697_s23  ;;  %p1349_p4 = por %p65_p2, %p64_p1 }
  0x13   : > { %s50_s26 = ssub.s32 %s1264_s19, %s1697_s23  ;;  %p154_p6 = scmp.eq.s32.totalorder %s1337_s21, 1 }
  0x14   : > { %p55_p7 = scmp.eq.s32.totalorder %s50_s26, 0  ;;  %p1357_p8 = por %p71_p5, %p70_p3 }
  0x15   : > { %p1361_p9 = por %p154_p6, %p64_p1  ;;  %p160_p10 = scmp.eq.s32.totalorder %s904_s22, 1 }
  0x16   : > { %s1671_s27 = scalar_select %p1357_p8, 1, 0 }
  0x17   : > { %s1672_s28 = scalar_select %p1361_p9, 1, 0 }
  0x18   : > { %s1366_s29 = scalar_select %p55_p7, %s1256_s17, %s57_s24  }
  0x19   : > { %p1368_p11 = por %p160_p10, %p70_p3  ;;  %p996_p13 = scmp.lt.s32.totalorder %s1268_s20, 2 }
  0x1a   : > { %1673 = sst [smem:[#allocation18_spill]] %s1366_s29  ;;  %s1655_s5 = sand.u32 1, %s1256_s17  }
  0x1b   : > { %s1674_s30 = scalar_select %p1368_p11, 1, 0 }
  0x1c   : > { %s1377_s6 = sshll.u32 %s1655_s5, 4  ;;  %s1380_s7 = sshll.u32 %s1264_s19, 8 }
  0x1d   : > { %p1384_p0 = pnand %p996_p13, %p1349_p4  ;;  %s234_s9 = sand.u32 1, %s1268_s20  }
  0x1e   : > { %s1676_s1 = sld [smem:[#allocation19_spill]]  ;;  %s238_s13 = scalar_lea.vmem [#allocation5], %s1377_s6 }
  0x1f   : > { %s247_s14 = sshll.u32 %s238_s13, 4  ;;  %s1400_s22 = scalar_lea.sflag [#allocation6], %s234_s9  ;;  %s1397_s14 = int_to_ptr.vmem [resolvable:$true] %s247_s14 }
  0x20   : > { %p1406_p4 = pneg %p1384_p0 }
  0x24   : > { %s1393_s12 = scalar_lea.hbm %s1676_s1, %s1380_s7  ;;  %s1065_s11 = scalar_lea.hbm %s1676_s1, 512 }
  0x25   : > { %s1060_s24 = scalar_lea.hbm %s1393_s12, 256  ;;  %p1066_p7 = scmp.lt.u32.totalorder %s1393_s12, %s1676_s1 }
  0x26   : > { %p1061_p3 = scmp.ne.s32.totalorder %s1393_s12, %s1060_s24  ;;  %p1067_p10 = scmp.lt.u32.totalorder %s1065_s11, %s1060_s24 }
  0x27   : > { %p1069_p12 = scmp.lt.u32.totalorder %s1060_s24, %s1393_s12 }
  0x28   : > { %p1063_p5 = pnand %p1406_p4, %p1061_p3  ;;  %p1068_p13 = por %p1067_p10, %p1066_p7 }
  0x2a   : > { %p1064_p6 = pneg %p1063_p5  ;;  %p1070_p1 = por %p1069_p12, %p1068_p13 }
  0x2c   : > { %p1071_p2 = pnand %p1070_p1, %p1064_p6 }
  0x2e   : > { %1074 = shalt.err (!%p1071_p2)
}
  0x2f   : > { %s1075_s9 = scalar_lea.vmem %s1397_s14, 256  ;;  %s1270_s26 = smov [#allocation5]  }
  0x30   : > { %p1076_p3 = scmp.ne.s32.totalorder %s1397_s14, %s1075_s9  ;;  %s1080_s10 = sshll.u32 %s1270_s26, 4  ;;  %s1081_s10 = int_to_ptr.vmem [resolvable:$false] %s1080_s10 }
  0x31   : > { %s1082_s5 = scalar_lea.vmem %s1081_s10, 512  ;;  %p1083_p9 = scmp.lt.s32.totalorder %s1397_s14, %s1081_s10 }
  0x32   : > { %p1078_p5 = pnand %p1076_p3, %p1406_p4  ;;  %p1084_p8 = scmp.lt.s32.totalorder %s1082_s5, %s1075_s9 }
  0x34   : > { %p1079_p11 = pneg %p1078_p5  ;;  %p1085_p7 = por %p1084_p8, %p1083_p9 }
  0x36   : > { %p1086_p10 = pnand %p1085_p7, %p1079_p11 }
  0x38   : > { %1089 = shalt.err (!%p1086_p10)
}
  0x39   : > { %s1658_s24 = smov 128   ;;  %s1660_s11 = smov 8  }
  0x3a   : > { %985 = dma.hbm_to_vmem [thread:$0]  (!%p1384_p0), %s1393_s12, 256, %s1397_s14, %s1400_s22, %s1658_s24, %s1658_s24, %s1660_s11  }
  0x3b   : > { %p1678_p8 = scmp.lt.s32.totalorder %s1268_s20, 3  ;;  %p1679_p9 = scmp.ge.s32.totalorder %s1268_s20, 1 }
  0x3c   : > { %s1445_s10 = scalar_lea.hbm %s1650_s0, %s1380_s7  ;;  %s214_s5 = scalar_lea.vmem [#allocation2], %s1377_s6 }
  0x3d   : > { %p1437_p11 = pnand %p1679_p9, %p1678_p8  ;;  %s224_s1 = sshll.u32 %s214_s5, 4  ;;  %s1448_s1 = int_to_ptr.vmem [resolvable:$true] %s224_s1 }
  0x3e   : > { %s1454_s24 = scalar_lea.hbm %s1652_s2, %s1380_s7  ;;  %s1681_s11 = sand.u32 1, %s1256_s17  }
  0x3f   : > { %s1680_s13 = scalar_select %p1437_p11, 1, 0 }
  0x40   : > { %s1458_s23 = scalar_lea.sflag [#allocation3], %s1681_s11  ;;  %s1090_s19 = scalar_lea.hbm %s1445_s10, 256 }
  0x41   : > { %p1091_p12 = scmp.ne.s32.totalorder %s1445_s10, %s1090_s19  ;;  %s1095_s29 = scalar_lea.hbm %s1650_s0, 512 }
  0x42   : > { %p1096_p6 = scmp.lt.u32.totalorder %s1445_s10, %s1650_s0  ;;  %p1097_p13 = scmp.lt.u32.totalorder %s1095_s29, %s1090_s19 }
  0x43   : > { %p1093_p1 = pnand %p1091_p12, %p1406_p4  ;;  %p1099_p5 = scmp.lt.u32.totalorder %s1090_s19, %s1445_s10 }
  0x44   : > { %p1098_p3 = por %p1097_p13, %p1096_p6 }
  0x45   : > { %p1094_p2 = pneg %p1093_p1 }
  0x46   : > { %p1100_p7 = por %p1099_p5, %p1098_p3 }
  0x48   : > { %p1101_p10 = pnand %p1100_p7, %p1094_p2 }
  0x4a   : > { %1104 = shalt.err (!%p1101_p10)
}
  0x4b   : > { %s1105_s7 = scalar_lea.vmem %s1448_s1, 256  ;;  %s1273_s11 = smov [#allocation2]  }
  0x4c   : > { %p1106_p8 = scmp.ne.s32.totalorder %s1448_s1, %s1105_s7  ;;  %s1110_s12 = sshll.u32 %s1273_s11, 4  ;;  %s1111_s12 = int_to_ptr.vmem [resolvable:$false] %s1110_s12 }
  0x4d   : > { %s1112_s20 = scalar_lea.vmem %s1111_s12, 512  ;;  %p1113_p1 = scmp.lt.s32.totalorder %s1448_s1, %s1111_s12 }
  0x4e   : > { %p1108_p9 = pnand %p1106_p8, %p1406_p4  ;;  %p1114_p11 = scmp.lt.s32.totalorder %s1112_s20, %s1105_s7 }
  0x50   : > { %p1109_p12 = pneg %p1108_p9  ;;  %p1115_p6 = por %p1114_p11, %p1113_p1 }
  0x52   : > { %p1116_p13 = pnand %p1115_p6, %p1109_p12 }
  0x54   : > { %1119 = shalt.err (!%p1116_p13)
}
  0x55   : > { %s1682_s19 = smov 8   ;;  %s1683_s29 = smov 128  }
  0x56   : > { %982 = dma.hbm_to_vmem [thread:$0]  (!%p1384_p0), %s1445_s10, 256, %s1448_s1, %s1458_s23, %s1683_s29, %s1683_s29, %s1682_s19  }
  0x57   : > { %s261_s14 = scalar_lea.vmem [#allocation7], %s1377_s6  ;;  %s1120_s26 = scalar_lea.hbm %s1454_s24, 256 }
  0x58   : > { %s270_s9 = sshll.u32 %s261_s14, 4  ;;  %p1121_p11 = scmp.ne.s32.totalorder %s1454_s24, %s1120_s26  ;;  %s1486_s9 = int_to_ptr.vmem [resolvable:$true] %s270_s9 }
  0x59   : > { %s1125_s11 = scalar_lea.hbm %s1652_s2, 512  ;;  %p1126_p5 = scmp.lt.u32.totalorder %s1454_s24, %s1652_s2 }
  0x5a   : > { %p1123_p2 = pnand %p1121_p11, %p1406_p4  ;;  %p1127_p7 = scmp.lt.u32.totalorder %s1125_s11, %s1120_s26 }
  0x5b   : > { %p1129_p8 = scmp.lt.u32.totalorder %s1120_s26, %s1454_s24 }
  0x5c   : > { %p1124_p3 = pneg %p1123_p2  ;;  %p1128_p10 = por %p1127_p7, %p1126_p5 }
  0x5e   : > { %p1130_p9 = por %p1129_p8, %p1128_p10 }
  0x60   : > { %p1131_p12 = pnand %p1130_p9, %p1124_p3 }
  0x62   : > { %1134 = shalt.err (!%p1131_p12)
}
  0x63   : > { %s1135_s1 = scalar_lea.vmem %s1486_s9, 256  ;;  %s1274_s23 = smov [#allocation7]  }
  0x64   : > { %p1136_p1 = scmp.ne.s32.totalorder %s1486_s9, %s1135_s1  ;;  %s1140_s6 = sshll.u32 %s1274_s23, 4  ;;  %s1141_s6 = int_to_ptr.vmem [resolvable:$false] %s1140_s6 }
  0x65   : > { %s1142_s10 = scalar_lea.vmem %s1141_s6, 512  ;;  %p1143_p11 = scmp.lt.s32.totalorder %s1486_s9, %s1141_s6 }
  0x66   : > { %p1138_p6 = pnand %p1136_p1, %p1406_p4  ;;  %p1144_p2 = scmp.lt.s32.totalorder %s1142_s10, %s1135_s1 }
  0x68   : > { %p1139_p13 = pneg %p1138_p6  ;;  %p1145_p5 = por %p1144_p2, %p1143_p11 }
  0x6a   : > { %p1146_p7 = pnand %p1145_p5, %p1139_p13 }
  0x6c   : > { %1149 = shalt.err (!%p1146_p7)
}
  0x6d   : > { %988 = dma.hbm_to_vmem [thread:$0]  (!%p1384_p0), %s1454_s24, 256, %s1486_s9, %s1400_s22, %s1683_s29, %s1683_s29, %s1682_s19  }
  0x6e   : > { %p1684_p4 = scmp.ne.s32.totalorder %s1680_s13, 0 }
  0x6f   : > { %s1516_s25 = sand.u32 (!%p1684_p4), 1, %s1252_s16   ;;  %p1685_p3 = scmp.ne.s32.totalorder (!%p1684_p4), %s1671_s27, 0 }
  0x70   : > { %282 = sbr.rel (%p1684_p4) target bundleno = 885 (0x375), region = 32  ;;  %s1519_s14 = sshll.u32 (!%p1684_p4), %s1516_s25, 4 }
  0x71   : > { %s285_s8 = scalar_lea.sflag (!%p1684_p4), [#allocation3], %s1516_s25  ;;  %s288_s26 = scalar_lea.vmem (!%p1684_p4), [#allocation2], %s1519_s14 }
  0x77   : > { %1231 = dma.done.wait (%p1685_p3), %s285_s8, 256  }
  0x78   : > { %1233 = vsyncadd (%p1685_p3), %s285_s8, 4294967040  ;;  %s293_s22 = sand.u32 1, %s1337_s21   ;;  %s297_s13 = scalar_lea.vmem [#allocation5], %s1519_s14 }
  0x79   : > { %s294_s24 = scalar_lea.sflag [#allocation6], %s293_s22 }
  0x7a   : > { %1235 = dma.done.wait (%p1685_p3), %s294_s24, 512  }
  0x7b   : > { %1237 = vsyncadd (%p1685_p3), %s294_s24, 4294966784  ;;  %v1275_v0 = vmov 0.0   ;;  %vm1276_vm0 = vmmov 0   ;;  %vm359_vm1 = vcmask 261120   ;;  %v353_v1 = vld [vmem:[%s297_s13] sm:$0xff]  ;;  %v354_v3 = vld [vmem:[%s297_s13 + $0x8] sm:$0xff] }
  0x7c   : > { %949 = vmatprep.subr.mxu0 %v1275_v0  ;;  %951 = vmatprep.mubr.msk.f32.mxu0 %vm1276_vm0, %v1275_v0  ;;  %v351_v2 = vld [vmem:[%s288_s26] sm:$0xff]  ;;  %v352_v5 = vld [vmem:[%s288_s26 + $0x8] sm:$0xff]  ;;  %vm512_vm2 = vcmask 64512   ;;  %s306_s21 = scalar_lea.vmem [#allocation7], %s1519_s14  ;;  %s345_s27 = scalar_lea.vmem [#allocation9], %s1519_s14 }
  0x7d   : > { %954 = vmatprep.subr.mxu1 %v1275_v0  ;;  %956 = vmatprep.mubr.msk.f32.mxu1 %vm1276_vm0, %v1275_v0  ;;  %v357_v4 = vmul.f32 0.17677669, %v351_v2  ;;  %v358_v6 = vmul.f32 0.17677669, %v352_v5  ;;  %v355_v23 = vld [vmem:[%s306_s21] sm:$0xff]  ;;  %v356_v24 = vld [vmem:[%s306_s21 + $0x8] sm:$0xff] }
  0x7e   : > { %950 = vmatpush3.xpose.msk.msra.mxu0 %vm359_vm1, %v353_v1  ;;  %955 = vmatpush3.xpose.msk.msra.mxu1 %vm359_vm1, %v354_v3  ;;  %s939_s19 = sshll.u32 %s1260_s18, 8  ;;  %s726_s29 = sshll.u32 %s345_s27, 4  ;;  %s1559_s29 = int_to_ptr.vmem [resolvable:$true] %s726_s29 }
  0x7f   : > { %959 = vmatprep.subr.mxu0 %v1275_v0  ;;  %964 = vmatprep.subr.mxu1 %v1275_v0  ;;  %s1557_s7 = scalar_lea.hbm %s1654_s4, %s939_s19  ;;  %s691_s11 = scalar_lea.sflag [#allocation10], %s1516_s25 }
  0x80   : > { %s1150_s12 = scalar_lea.vmem %s1559_s29, 256  ;;  %p1686_p10 = scmp.ne.s32.totalorder %s1672_s28, 0 }
  0x81   : > { %952 = vmatmul.mubr.msk.f32.vlgmr.msra.gmra.mrb[0].mxu0 %vm359_vm1, %v357_v4  ;;  %957 = vmatmul.mubr.msk.f32.vlgmr.msra.gmra.mrb[0].mxu1 %vm359_vm1, %v358_v6  ;;  %p1151_p0 = scmp.ne.s32.totalorder %s1559_s29, %s1150_s12  ;;  %s1277_s20 = smov [#allocation9]  }
  0x82   : > { %961 = vmatprep.mubr.msk.f32.mxu0 %vm1276_vm0, %v1275_v0  ;;  %966 = vmatprep.mubr.msk.f32.mxu1 %vm1276_vm0, %v1275_v0  ;;  %s1154_s1 = sshll.u32 %s1277_s20, 4  ;;  %s1155_s1 = int_to_ptr.vmem [resolvable:$false] %s1154_s1 }
  0x83   : > { %960 = vmatpush3.msra.mxu0 %v355_v23  ;;  %965 = vmatpush3.msra.mxu1 %v356_v24  ;;  %p1152_p8 = pnand %p1151_p0, %p1686_p10  ;;  %s1156_s23 = scalar_lea.vmem %s1155_s1, 512 }
  0x84   : > { %p1157_p12 = scmp.lt.s32.totalorder %s1559_s29, %s1155_s1  ;;  %p1158_p1 = scmp.lt.s32.totalorder %s1156_s23, %s1150_s12 }
  0x85   : > { %p1153_p9 = pneg %p1152_p8 }
  0x86   : > { %p1159_p6 = por %p1158_p1, %p1157_p12 }
  0x88   : > { %p1160_p13 = pnand %p1159_p6, %p1153_p9 }
 0x154   : > { %v432_v7 = vpop.f32.mrb[0].mxu0  ;;  %v508_v8 = vpop.f32.mrb[0].mxu1 }
 0x155   : > { %v953_v9 = vpop.f32.mrb[1].mxu0  ;;  %v513_v10 = vsel %vm512_vm2, %v432_v7, -inf  ;;  %v958_v11 = vpop.f32.mrb[1].mxu1  ;;  %v516_v12 = vsel %vm512_vm2, %v508_v8, -inf }
 0x156   : > { %514 = vmax.xlane.f32.xlu0 %v513_v10 }
 0x15a   : > { %517 = vmax.xlane.f32.xlu0 %v516_v12 }
 0x1e3   : > { %v515_v13 = vpop.xlane.xlu0 %514 }
 0x1e4   : > { %v519_v14 = vsub.f32 %v432_v7, %v515_v13 }
 0x1e6   : > { %v521_v15 = vmul.f32 1.442695, %v519_v14 }
 0x1e7   : > { %v518_v16 = vpop.xlane.xlu0 %517 }
 0x1e8   : > { %1052 = vpow2.f32 %v521_v15  ;;  %v520_v17 = vsub.f32 %v508_v8, %v518_v16 }
 0x1ea   : > { %v523_v18 = vmul.f32 1.442695, %v520_v17 }
 0x1ec   : > { %1054 = vpow2.f32 %v523_v18 }
 0x1f2   : > { %v1053_v19 = vpop.eup %1052 }
 0x1f3   : > { %v525_v20 = vsel %vm512_vm2, %v1053_v19, 0.0 }
 0x1f4   : > { %526 = vadd.xlane.f32.xlu1 %v525_v20 }
 0x1f6   : > { %v1055_v21 = vpop.eup %1054 }
 0x1f7   : > { %v528_v22 = vsel %vm512_vm2, %v1055_v21, 0.0 }
 0x1f8   : > { %529 = vadd.xlane.f32.xlu1 %v528_v22 }
 0x281   : > { %v527_v25 = vpop.xlane.xlu1 %526 }
 0x282   : > { %1056 = vrcp.f32 %v527_v25 }
 0x285   : > { %v530_v26 = vpop.xlane.xlu1 %529 }
 0x286   : > { %1058 = vrcp.f32 %v530_v26 }
 0x28c   : > { %v1057_v27 = vpop.eup %1056 }
 0x28d   : > { %v533_v28 = vmul.f32 %v1057_v27, %v1053_v19 }
 0x28f   : > { %962 = vmatmul.mubr.msk.f32.vlgmr.msra.gmra.mrb[2].mxu0 %vm512_vm2, %v533_v28  ;;  %535 = vst.msk [vmem:[%s345_s27] sm:$0xff] %vm512_vm2, %v533_v28 }
 0x290   : > { %v1059_v29 = vpop.eup %1058 }
 0x291   : > { %v534_v30 = vmul.f32 %v1059_v29, %v1055_v21 }
 0x293   : > { %967 = vmatmul.mubr.msk.f32.vlgmr.msra.gmra.mrb[2].mxu1 %vm512_vm2, %v534_v30  ;;  %536 = vst.msk [vmem:[%s345_s27 + $0x8] sm:$0xff] %vm512_vm2, %v534_v30 }
 0x294   : > { %1163 = shalt.err (!%p1160_p13)
}
 0x295   : > { %s1164_s6 = scalar_lea.hbm %s1557_s7, 256  ;;  %s1168_s26 = scalar_lea.hbm %s1654_s4, 512 }
 0x296   : > { %p1165_p11 = scmp.ne.s32.totalorder %s1557_s7, %s1164_s6  ;;  %p1169_p7 = scmp.lt.u32.totalorder %s1557_s7, %s1654_s4 }
 0x297   : > { %p1170_p4 = scmp.lt.u32.totalorder %s1168_s26, %s1164_s6  ;;  %p1172_p0 = scmp.lt.u32.totalorder %s1164_s6, %s1557_s7 }
 0x298   : > { %p1166_p2 = pnand %p1165_p11, %p1686_p10 }
 0x299   : > { %p1171_p3 = por %p1170_p4, %p1169_p7 }
 0x29a   : > { %p1167_p5 = pneg %p1166_p2 }
 0x29b   : > { %p1173_p8 = por %p1172_p0, %p1171_p3 }
 0x29d   : > { %p1174_p9 = pnand %p1173_p8, %p1167_p5 }
 0x29f   : > { %1177 = shalt.err (!%p1174_p9)
}
 0x2a0   : > { %s1278_s13 = smov 128   ;;  %s1279_s21 = smov 8  }
 0x2a1   : > { %976 = dma.vmem_to_hbm [thread:$0]  (%p1686_p10), %s1559_s29, 256, %s1557_s7, %s691_s11, %s1278_s13, %s1278_s13, %s1279_s21  }
 0x2a2   : > { %s338_s27 = scalar_lea.vmem [#allocation8], %s1519_s14  ;;  %s1597_s20 = scalar_lea.hbm %s1653_s3, %s939_s19 }
 0x2a3   : > { %s707_s9 = sshll.u32 %s338_s27, 4  ;;  %s686_s14 = scalar_lea.sflag [#allocation4], %s1516_s25  ;;  %s1590_s9 = int_to_ptr.vmem [resolvable:$true] %s707_s9 }
 0x2a4   : > { %s1178_s29 = scalar_lea.vmem %s1590_s9, 256  ;;  %s1280_s7 = smov [#allocation8]  }
 0x2a5   : > { %p1179_p12 = scmp.ne.s32.totalorder %s1590_s9, %s1178_s29  ;;  %s1182_s18 = sshll.u32 %s1280_s7, 4  ;;  %s1183_s18 = int_to_ptr.vmem [resolvable:$false] %s1182_s18 }
 0x2a6   : > { %s1184_s11 = scalar_lea.vmem %s1183_s18, 512  ;;  %p1185_p13 = scmp.lt.s32.totalorder %s1590_s9, %s1183_s18 }
 0x2a7   : > { %p1180_p1 = pnand %p1179_p12, %p1686_p10  ;;  %p1186_p11 = scmp.lt.s32.totalorder %s1184_s11, %s1178_s29 }
 0x2a9   : > { %p1181_p6 = pneg %p1180_p1  ;;  %p1187_p2 = por %p1186_p11, %p1185_p13 }
 0x2ab   : > { %p1188_p5 = pnand %p1187_p2, %p1181_p6 }
 0x362   : > { %v606_v31 = vpop.f32.mrb[2].mxu0 }
 0x363   : > { %683 = vst.msk [vmem:[%s338_s27] sm:$0xff] %vm359_vm1, %v606_v31  ;;  %v963_v32 = vpop.f32.mrb[3].mxu0 }
 0x366   : > { %v679_v33 = vpop.f32.mrb[2].mxu1 }
 0x367   : > { %684 = vst.msk [vmem:[%s338_s27 + $0x8] sm:$0xff] %vm359_vm1, %v679_v33  ;;  %v968_v34 = vpop.f32.mrb[3].mxu1 }
 0x368   : > { %1191 = shalt.err (!%p1188_p5)
}
 0x369   : > { %s1192_s19 = scalar_lea.hbm %s1597_s20, 256  ;;  %s1196_s6 = scalar_lea.hbm %s1653_s3, 512 }
 0x36a   : > { %p1193_p7 = scmp.ne.s32.totalorder %s1597_s20, %s1192_s19  ;;  %p1197_p0 = scmp.lt.u32.totalorder %s1597_s20, %s1653_s3 }
 0x36b   : > { %p1198_p8 = scmp.lt.u32.totalorder %s1196_s6, %s1192_s19  ;;  %p1200_p12 = scmp.lt.u32.totalorder %s1192_s19, %s1597_s20 }
 0x36c   : > { %p1194_p4 = pnand %p1193_p7, %p1686_p10 }
 0x36d   : > { %p1199_p9 = por %p1198_p8, %p1197_p0 }
 0x36e   : > { %p1195_p3 = pneg %p1194_p4 }
 0x36f   : > { %p1201_p1 = por %p1200_p12, %p1199_p9 }
 0x371   : > { %p1202_p6 = pnand %p1201_p1, %p1195_p3 }
 0x373   : > { %1205 = shalt.err (!%p1202_p6)
}
 0x374   : > { %975 = dma.vmem_to_hbm [thread:$0]  (%p1686_p10), %s1590_s9, 256, %s1597_s20, %s686_s14, %s1278_s13, %s1278_s13, %s1279_s21  }
 0x375 PF: > { %s1687_s26 = sld [smem:[#allocation16_spill]]  ;;  %s741_s22 = sand.u32 1, %s1248_s15  }
 0x376   : > { %p1688_p13 = scmp.ne.s32.totalorder %s1674_s30, 0  ;;  %s742_s24 = scalar_lea.sflag [#allocation4], %s741_s22 }
 0x37b   : > { %p1689_p11 = scmp.ge.s32.totalorder %s1687_s26, 2 }
 0x37d   : > { %p990_p2 = pnand %p1689_p11, %p1688_p13 }
 0x37f   : > { %1239 = dma.done.wait (!%p990_p2), %s742_s24, 256  }
 0x380   : > { %1241 = vsyncadd (!%p990_p2), %s742_s24, 4294967040  ;;  %s751_s28 = scalar_lea.sflag [#allocation10], %s741_s22 }
 0x381   : > { %1243 = dma.done.wait (!%p990_p2), %s751_s28, 256  }
 0x382   : > { %1245 = vsyncadd (!%p990_p2), %s751_s28, 4294967040  ;;  %s27_s20 = sadd.s32 1, %s1687_s26   ;;  %s1690_s25 = sld [smem:[#allocation18_spill]] }
 0x383   : > { %p24_p5 = scmp.ge.s32.totalorder %s27_s20, 4   ;;  %s1691_s18 = sld [smem:[#allocation15_spill]] }
 0x384   : > { %s1692_s19 = sld [smem:[#allocation17_spill]]  ;;  %s1693_s15 = smov %s1252_s16 }
 0x385   : > { %s1694_s16 = smov %s1256_s17  ;;  %26 = sbr.rel (!%p24_p5) target bundleno = 12 (0xc), region = 118 }
 0x388   : > { %s1695_s17 = smov %s1690_s25 }
 0x38c   :  { %756 = vsyncpa [#allocation3], 1 }
 0x38d   :  { %758 = vsyncpa [#allocation3 + $0x1], 1 }
 0x38e   :  { %759 = vsyncpa [#allocation6], 1 }
 0x38f   :  { %761 = vsyncpa [#allocation6 + $0x1], 1 }
 0x390   :  { %762 = vsyncpa [#allocation4], 1 }
 0x391   :  { %764 = vsyncpa [#allocation4 + $0x1], 1 }
 0x392   :  { %765 = vsyncpa [#allocation10], 1 }
 0x393   :  { %767 = vsyncpa [#allocation10 + $0x1], 1 }

</bundles_post_ra>
